<compile_context>
chip_gen: v6e
topology: v6e:2x2x1
jax: 0.10.0
libtpu: 0.0.40
codegen_flags: <defaults>
</compile_context>

<pallas_src>
import jax
import jax.numpy as jnp
from jax.experimental import pallas as pl
from jax.experimental.pallas import tpu as pltpu

LANE = 128  # vreg lane width


def _round_up(x, m):
    return (x + m - 1) // m * m


def qnetwork_kernel(x_ref, w1_ref, b1_ref, w2_ref, b2_ref, o_ref):
    # One batch tile per grid step: fc1 (MXU) -> bias+ReLU (VPU, f32) -> fc2 (MXU)
    # -> bias -> store (lane-dense, unmasked vst).
    x = x_ref[...]
    h = jnp.dot(x, w1_ref[...], preferred_element_type=jnp.float32)
    h = jnp.maximum(h + b1_ref[...], 0.0)
    out = jnp.dot(h.astype(w2_ref.dtype), w2_ref[...],
                  preferred_element_type=jnp.float32)
    o_ref[...] = (out + b2_ref[...]).astype(o_ref.dtype)


def qnetwork_forward(x, w1, b1, w2, b2, *, compute_dtype=jnp.float32, tile_b=512):
    """x: [batch, input_dim]; w1: [input_dim, H]; b1: [H]; w2: [H, out]; b2: [out]."""
    batch, input_dim = x.shape
    hidden, output_dim = w2.shape
    assert w1.shape == (input_dim, hidden)
    assert b1.shape[-1] == hidden and b2.shape[-1] == output_dim

    hid_pad = _round_up(hidden, LANE)      # full-vreg intermediate (64 -> 128)
    out_pad = _round_up(output_dim, LANE)  # lane-dense output stores

    # Zero-pad weights/biases once in the wrapper (static, tiny).
    w1p = jnp.zeros((input_dim, hid_pad), compute_dtype).at[:, :hidden].set(
        w1.astype(compute_dtype))
    b1p = jnp.zeros((1, hid_pad), jnp.float32).at[0, :hidden].set(
        b1.astype(jnp.float32).reshape(-1))
    w2p = jnp.zeros((hid_pad, out_pad), compute_dtype).at[:hidden, :output_dim].set(
        w2.astype(compute_dtype))
    b2p = jnp.zeros((1, out_pad), jnp.float32).at[0, :output_dim].set(
        b2.astype(jnp.float32).reshape(-1))

    # Batch tile: multiple of 16 (covers f32 (8,128) and bf16 (16,128) sublane tiles),
    # capped so the double-buffered working set stays far under the scoped-VMEM default
    # on every generation (v7x has only 32 MiB scoped by default).
    tile_b = max(16, min(int(tile_b), _round_up(batch, 16)))
    batch_pad = _round_up(batch, tile_b)
    xp = x.astype(compute_dtype)
    if batch_pad != batch:
        xp = jnp.zeros((batch_pad, input_dim), compute_dtype).at[:batch].set(xp)

    grid = (batch_pad // tile_b,)

    itemsize = jnp.dtype(compute_dtype).itemsize
    cost = pl.CostEstimate(
        flops=2 * batch_pad * (input_dim * hid_pad + hid_pad * out_pad),
        transcendentals=0,
        bytes_accessed=(xp.size * itemsize + w1p.size * itemsize + w2p.size * itemsize
                        + b1p.size * 4 + b2p.size * 4 + batch_pad * out_pad * 4),
    )

    out_padded = pl.pallas_call(
        qnetwork_kernel,
        out_shape=jax.ShapeDtypeStruct((batch_pad, out_pad), jnp.float32),
        grid=grid,
        in_specs=[
            # x: pipelined batch tiles (double-buffered HBM->VMEM DMA).
            pl.BlockSpec((tile_b, input_dim), lambda i: (i, 0)),
            # Weights / biases: full-array blocks whose index_map ignores the batch
            # index, so they stay VMEM-resident across the whole grid (no per-step DMA).
            pl.BlockSpec((input_dim, hid_pad), lambda i: (0, 0)),
            pl.BlockSpec((1, hid_pad), lambda i: (0, 0)),
            pl.BlockSpec((hid_pad, out_pad), lambda i: (0, 0)),
            pl.BlockSpec((1, out_pad), lambda i: (0, 0)),
        ],
        out_specs=pl.BlockSpec((tile_b, out_pad), lambda i: (i, 0)),
        compiler_params=pltpu.CompilerParams(
            dimension_semantics=("parallel",),      # megacore sharding on v7x
            vmem_limit_bytes=32 * 1024 * 1024,      # safe on v5e/v6e/v7x
        ),
        cost_estimate=cost,
    )(xp, w1p, b1p, w2p, b2p)

    # Slice away batch / output-lane padding -> exact QNetwork output shape.
    return out_padded[:batch, :output_dim]


def init_qnetwork_params(key, input_dim, output_dim, hidden=64):
    """PyTorch nn.Linear default init: U[-1/sqrt(fan_in), 1/sqrt(fan_in)]."""
    k1, k2, k3, k4 = jax.random.split(key, 4)
    bound1 = 1.0 / jnp.sqrt(jnp.float32(input_dim))
    bound2 = 1.0 / jnp.sqrt(jnp.float32(hidden))
    w1 = jax.random.uniform(k1, (input_dim, hidden), jnp.float32, -bound1, bound1)
    b1 = jax.random.uniform(k2, (hidden,), jnp.float32, -bound1, bound1)
    w2 = jax.random.uniform(k3, (hidden, output_dim), jnp.float32, -bound2, bound2)
    b2 = jax.random.uniform(k4, (output_dim,), jnp.float32, -bound2, bound2)
    return w1, b1, w2, b2


if __name__ == "__main__":
    # DQN-style shapes (CartPole: 4-dim state, 2 actions).
    batch, input_dim, output_dim = 8, 4, 2

    key = jax.random.PRNGKey(0)
    kx, kp = jax.random.split(key)
    x = jax.random.normal(kx, (batch, input_dim), jnp.float32)
    w1, b1, w2, b2 = init_qnetwork_params(kp, input_dim, output_dim)

    ref = jnp.maximum(x @ w1 + b1[None, :], 0.0) @ w2 + b2[None, :]

    # f32 path (default): exact vs. reference.
    out = jax.block_until_ready(qnetwork_forward(x, w1, b1, w2, b2))
    assert out.shape == (batch, output_dim)
    assert jnp.allclose(out, ref, atol=1e-5, rtol=1e-5)

    # Replay-buffer-sized, ragged batch (exercises batch padding + multi-step grid).
    big_batch = 300
    xb = jax.random.normal(kx, (big_batch, input_dim), jnp.float32)
    out_big = jax.block_until_ready(qnetwork_forward(xb, w1, b1, w2, b2, tile_b=128))
    ref_big = jnp.maximum(xb @ w1 + b1[None, :], 0.0) @ w2 + b2[None, :]
    assert out_big.shape == (big_batch, output_dim)
    assert jnp.allclose(out_big, ref_big, atol=1e-5, rtol=1e-5)

    # bf16 MXU path (v6e/v7x-oriented): f32 accumulation, loose tolerance.
    out_bf16 = jax.block_until_ready(
        qnetwork_forward(x, w1, b1, w2, b2, compute_dtype=jnp.bfloat16))
    assert out_bf16.shape == (batch, output_dim)
    assert jnp.allclose(out_bf16, ref, atol=5e-2, rtol=5e-2)

    print("KERNEL_OK")
</pallas_src>

<mosaic_0001>
module attributes {stable_mosaic.version = 11 : i64} {
  func.func @qnetwork_kernel(%arg0: i32, %arg1: memref<16x4xf32, #tpu.memory_space<vmem>>, %arg2: memref<4x128xf32, #tpu.memory_space<vmem>>, %arg3: memref<1x128xf32, #tpu.memory_space<vmem>>, %arg4: memref<128x128xf32, #tpu.memory_space<vmem>>, %arg5: memref<1x128xf32, #tpu.memory_space<vmem>>, %arg6: memref<16x128xf32, #tpu.memory_space<vmem>>) attributes {dimension_semantics = [#tpu.dimension_semantics<parallel>], iteration_bounds = array<i64: 1>, scalar_prefetch = 0 : i64, scratch_operands = 0 : i64, tpu.core_type = #tpu.core_type<tc>, window_params = [{transform_indices = @transform_0, window_bounds = array<i64: 16, 4>}, {pipeline_mode = #tpu.pipeline_mode<synchronous>, transform_indices = @transform_1, window_bounds = array<i64: 4, 128>}, {pipeline_mode = #tpu.pipeline_mode<synchronous>, transform_indices = @transform_2, window_bounds = array<i64: 1, 128>}, {pipeline_mode = #tpu.pipeline_mode<synchronous>, transform_indices = @transform_3, window_bounds = array<i64: 128, 128>}, {pipeline_mode = #tpu.pipeline_mode<synchronous>, transform_indices = @transform_4, window_bounds = array<i64: 1, 128>}, {transform_indices = @transform_5, window_bounds = array<i64: 16, 128>}]} {
    %c0 = arith.constant 0 : index
    %c0_0 = arith.constant 0 : index
    %0 = vector.load %arg1[%c0, %c0_0] : memref<16x4xf32, #tpu.memory_space<vmem>>, vector<16x4xf32>
    %c0_1 = arith.constant 0 : index
    %c0_2 = arith.constant 0 : index
    %1 = vector.load %arg2[%c0_1, %c0_2] : memref<4x128xf32, #tpu.memory_space<vmem>>, vector<4x128xf32>
    %cst = arith.constant dense<0.000000e+00> : vector<16x128xf32>
    %2 = tpu.matmul %0, %1, %cst {dimension_numbers = #tpu.dot_dimension_numbers<[1], [0], [0], [1], [0, 0, 1, 1], [], []>} : vector<16x4xf32>, vector<4x128xf32>, vector<16x128xf32> -> vector<16x128xf32>
    %c0_3 = arith.constant 0 : index
    %c0_4 = arith.constant 0 : index
    %3 = vector.load %arg3[%c0_3, %c0_4] : memref<1x128xf32, #tpu.memory_space<vmem>>, vector<1x128xf32>
    %4 = vector.broadcast %3 : vector<1x128xf32> to vector<16x128xf32>
    %5 = arith.addf %2, %4 : vector<16x128xf32>
    %cst_5 = arith.constant 0.000000e+00 : f32
    %6 = vector.broadcast %cst_5 : f32 to vector<16x128xf32>
    %7 = arith.maximumf %5, %6 : vector<16x128xf32>
    %c0_6 = arith.constant 0 : index
    %c0_7 = arith.constant 0 : index
    %8 = vector.load %arg4[%c0_6, %c0_7] : memref<128x128xf32, #tpu.memory_space<vmem>>, vector<128x128xf32>
    %cst_8 = arith.constant dense<0.000000e+00> : vector<16x128xf32>
    %9 = tpu.matmul %7, %8, %cst_8 {dimension_numbers = #tpu.dot_dimension_numbers<[1], [0], [0], [1], [0, 0, 1, 1], [], []>} : vector<16x128xf32>, vector<128x128xf32>, vector<16x128xf32> -> vector<16x128xf32>
    %c0_9 = arith.constant 0 : index
    %c0_10 = arith.constant 0 : index
    %10 = vector.load %arg5[%c0_9, %c0_10] : memref<1x128xf32, #tpu.memory_space<vmem>>, vector<1x128xf32>
    %11 = vector.broadcast %10 : vector<1x128xf32> to vector<16x128xf32>
    %12 = arith.addf %9, %11 : vector<16x128xf32>
    %c0_11 = arith.constant 0 : index
    %c0_12 = arith.constant 0 : index
    %13 = vector.load %arg6[%c0_11, %c0_12] : memref<16x128xf32, #tpu.memory_space<vmem>>, vector<16x128xf32>
    tpu.vector_store %arg6[%c0_11, %c0_12], %12 {strides = array<i32>} : memref<16x128xf32, #tpu.memory_space<vmem>>, vector<16x128xf32>,
    return
  }
  func.func @transform_0(%arg0: i32) -> (i32, i32) {
    %c0_i32 = arith.constant 0 : i32
    %c0_i32_0 = arith.constant 0 : i32
    return %arg0, %c0_i32 : i32, i32
  }
  func.func @transform_1(%arg0: i32) -> (i32, i32) {
    %c0_i32 = arith.constant 0 : i32
    %c0_i32_0 = arith.constant 0 : i32
    %c0_i32_1 = arith.constant 0 : i32
    return %c0_i32, %c0_i32_0 : i32, i32
  }
  func.func @transform_2(%arg0: i32) -> (i32, i32) {
    %c0_i32 = arith.constant 0 : i32
    %c0_i32_0 = arith.constant 0 : i32
    %c0_i32_1 = arith.constant 0 : i32
    return %c0_i32, %c0_i32_0 : i32, i32
  }
  func.func @transform_3(%arg0: i32) -> (i32, i32) {
    %c0_i32 = arith.constant 0 : i32
    %c0_i32_0 = arith.constant 0 : i32
    %c0_i32_1 = arith.constant 0 : i32
    return %c0_i32, %c0_i32_0 : i32, i32
  }
  func.func @transform_4(%arg0: i32) -> (i32, i32) {
    %c0_i32 = arith.constant 0 : i32
    %c0_i32_0 = arith.constant 0 : i32
    %c0_i32_1 = arith.constant 0 : i32
    return %c0_i32, %c0_i32_0 : i32, i32
  }
  func.func @transform_5(%arg0: i32) -> (i32, i32) {
    %c0_i32 = arith.constant 0 : i32
    %c0_i32_0 = arith.constant 0 : i32
    return %arg0, %c0_i32 : i32, i32
  }
}

</mosaic_0001>

<bundles_post_ra>
// kernel: tpu_custom_call.1
= control target key start
LH: loop header
LB: loop body
LE: loop exit
PB: predicated region body
PF: predicated region fallthrough
CT: control target
= control target key end

     0   :  { %10 = vsyncpa [#allocation3], 0  ;;  %s425_s0 = inlined_call_operand.vmem [shape: f32[16,4], index: 0, kind: input, shape index: {}]   ;;  %s426_s1 = inlined_call_operand.vmem [shape: f32[4,128], index: 1, kind: input, shape index: {}]   ;;  %s427_s2 = inlined_call_operand.vmem [shape: f32[1,128], index: 2, kind: input, shape index: {}]   ;;  %s428_s3 = inlined_call_operand.hbm [shape: f32[128,128], index: 3, kind: input, shape index: {}]   ;;  %s429_s4 = inlined_call_operand.vmem [shape: f32[1,128], index: 4, kind: input, shape index: {}]   ;;  %s430_s5 = inlined_call_operand.hbm [shape: f32[16,128], index: 5, kind: output, shape index: {}]  }
   0x1   :  { %11 = vsyncpa [#allocation4], 0  ;;  %s364_s18 = smov [#allocation2]  }
   0x2   :  { %s23_s19 = sshll.u32 %s364_s18, 4  ;;  %s24_s19 = int_to_ptr.vmem [resolvable:$true] %s23_s19 }
   0x3   :  { %s328_s20 = scalar_lea.vmem %s24_s19, 2048  ;;  %p333_p1 = scmp.lt.s32.totalorder %s24_s19, %s24_s19 }
   0x4   :  { %p329_p0 = scmp.ne.s32.totalorder %s24_s19, %s328_s20  ;;  %p334_p2 = scmp.lt.s32.totalorder %s328_s20, %s328_s20 }
   0x6   :  { %p335_p3 = por %p334_p2, %p333_p1 }
   0x8   :  { %p336_p4 = pnand %p335_p3, %p329_p0 }
   0xa   :  { %339 = shalt.err (!%p336_p4)
}
   0xb   :  { %s365_s21 = smov 128   ;;  %s366_s22 = smov 8  }
   0xc   :  { %29 = dma.hbm_to_vmem [thread:$0]  %s428_s3, 2048, %s24_s19, [#allocation3], %s365_s21, %s365_s21, %s366_s22  }
   0xd   :  { %360 = dma.done.wait [#allocation3], 2048  }
   0xe   :  { %361 = vsyncadd [#allocation3], 4294965248  ;;  %vm52_vm0 = vcmask 1043456   ;;  %vm45_vm1 = vcmask 31744   ;;  %v37_v0 = vld [vmem:[%s426_s1] sm:$0xf] }
   0xf   :  { %v35_v1 = vld [vmem:[%s425_s0] sm:$0xff]  ;;  %v36_v2 = vld [vmem:[%s425_s0 + $0x8] sm:$0xff]  ;;  %276 = vmatprep.subr.msk.mxu0 %vm52_vm0, %v37_v0  ;;  %v148_v3 = vld [vmem:[#allocation2 + $0x78] sm:$0xff]  ;;  %s367_s7 = smov [#allocation5]  }
  0x10   :  { %278 = vmatprep.mubr.msk.f32.mxu0 %vm45_vm1, %v35_v1  ;;  %v147_v4 = vld [vmem:[#allocation2 + $0x70] sm:$0xff]  ;;  %277 = vmatpush3.msk.msra.mxu0 %vm52_vm0, %v37_v0  ;;  %v146_v5 = vld [vmem:[#allocation2 + $0x68] sm:$0xff]  ;;  %v145_v6 = vld [vmem:[#allocation2 + $0x60] sm:$0xff]  ;;  %s238_s8 = sshll.u32 %s367_s7, 4  ;;  %s239_s8 = int_to_ptr.vmem [resolvable:$true] %s238_s8 }
  0x11   :  { %281 = vmatprep.subr.mxu1 %v148_v3  ;;  %279 = vmatmul.mubr.msk.f32.vlgmr.msra.gmra.mxu0 %vm45_vm1, %v36_v2  ;;  %v144_v7 = vld [vmem:[#allocation2 + $0x58] sm:$0xff]  ;;  %v143_v8 = vld [vmem:[#allocation2 + $0x50] sm:$0xff]  ;;  %v142_v9 = vld [vmem:[#allocation2 + $0x48] sm:$0xff]  ;;  %p345_p6 = scmp.lt.s32.totalorder %s239_s8, %s239_s8 }
  0x12   :  { %282 = vmatpush3.msra.mxu1 %v148_v3  ;;  %v141_v10 = vld [vmem:[#allocation2 + $0x40] sm:$0xff]  ;;  %v140_v11 = vld [vmem:[#allocation2 + $0x38] sm:$0xff]  ;;  %v139_v12 = vld [vmem:[#allocation2 + $0x30] sm:$0xff] }
  0x13   :  { %283 = vmatprep.subr.mxu1 %v147_v4  ;;  %v138_v13 = vld [vmem:[#allocation2 + $0x28] sm:$0xff]  ;;  %v137_v14 = vld [vmem:[#allocation2 + $0x20] sm:$0xff]  ;;  %v136_v15 = vld [vmem:[#allocation2 + $0x18] sm:$0xff] }
  0x14   :  { %284 = vmatpush3.msra.mxu1 %v147_v4  ;;  %v135_v16 = vld [vmem:[#allocation2 + $0x10] sm:$0xff]  ;;  %v134_v17 = vld [vmem:[#allocation2 + $0x8] sm:$0xff]  ;;  %v133_v18 = vld [vmem:[#allocation2] sm:$0xff] }
  0x15   :  { %285 = vmatprep.subr.mxu1 %v146_v5  ;;  %v250_v19 = vld [vmem:[%s427_s2] ss:$0 sm:$0xff]  ;;  %s340_s2 = scalar_lea.vmem %s239_s8, 256 }
  0x16   :  { %286 = vmatpush3.msra.mxu1 %v146_v5  ;;  %v254_v26 = vld [vmem:[%s429_s4] ss:$0 sm:$0xff]  ;;  %p341_p5 = scmp.ne.s32.totalorder %s239_s8, %s340_s2  ;;  %p346_p7 = scmp.lt.s32.totalorder %s340_s2, %s340_s2 }
  0x17   :  { %287 = vmatprep.subr.mxu1 %v145_v6 }
  0x18   :  { %288 = vmatpush3.msra.mxu1 %v145_v6  ;;  %p347_p8 = por %p346_p7, %p345_p6 }
  0x19   :  { %289 = vmatprep.subr.mxu1 %v144_v7 }
  0x1a   :  { %290 = vmatpush3.msra.mxu1 %v144_v7  ;;  %p348_p9 = pnand %p347_p8, %p341_p5 }
  0x1b   :  { %291 = vmatprep.subr.mxu1 %v143_v8 }
  0x1c   :  { %292 = vmatpush3.msra.mxu1 %v143_v8 }
  0x1d   :  { %293 = vmatprep.subr.mxu1 %v142_v9 }
  0x1e   :  { %294 = vmatpush3.msra.mxu1 %v142_v9 }
  0x1f   :  { %295 = vmatprep.subr.mxu1 %v141_v10 }
  0x20   :  { %296 = vmatpush3.msra.mxu1 %v141_v10 }
  0x21   :  { %297 = vmatprep.subr.mxu1 %v140_v11 }
  0x22   :  { %298 = vmatpush3.msra.mxu1 %v140_v11 }
  0x23   :  { %299 = vmatprep.subr.mxu1 %v139_v12 }
  0x24   :  { %300 = vmatpush3.msra.mxu1 %v139_v12 }
  0x25   :  { %301 = vmatprep.subr.mxu1 %v138_v13 }
  0x26   :  { %302 = vmatpush3.msra.mxu1 %v138_v13 }
  0x27   :  { %303 = vmatprep.subr.mxu1 %v137_v14 }
  0x28   :  { %304 = vmatpush3.msra.mxu1 %v137_v14 }
  0x29   :  { %305 = vmatprep.subr.mxu1 %v136_v15 }
  0x2a   :  { %306 = vmatpush3.msra.mxu1 %v136_v15 }
  0x2b   :  { %307 = vmatprep.subr.mxu1 %v135_v16 }
  0x2c   :  { %308 = vmatpush3.msra.mxu1 %v135_v16 }
  0x2d   :  { %309 = vmatprep.subr.mxu1 %v134_v17 }
  0x2e   :  { %310 = vmatpush3.msra.mxu1 %v134_v17 }
  0x2f   :  { %311 = vmatprep.subr.mxu1 %v133_v18 }
  0x30   :  { %312 = vmatpush3.msra.mxu1 %v133_v18 }
  0xd1   :  { %v280_v20 = vpop.f32.mrf.mxu0 }
  0xd2   :  { %v128_v21 = vadd.f32 %v280_v20, %v250_v19 }
  0xd3   :  { %v122_v22 = vpop.f32.mrf.mxu0 }
  0xd4   :  { %v123_v23 = vadd.f32 %v250_v19, %v122_v22  ;;  %v132_v25 = vmax.f32 %v128_v21, 0.0 }
  0xd6   :  { %v131_v24 = vmax.f32 %v123_v23, 0.0 }
  0xd8   :  { %313 = vmatprep.mubr.f32.mxu1 %v131_v24 }
  0xd9   :  { %314 = vmatmul.mubr.f32.vlgmr.msra.gmra.mxu1 %v132_v25 }
 0x199   :  { %v315_v27 = vpop.f32.mrf.mxu1 }
 0x19a   :  { %v228_v28 = vadd.f32 %v315_v27, %v254_v26 }
 0x19b   :  { %v222_v29 = vpop.f32.mrf.mxu1 }
 0x19c   :  { %232 = vst [vmem:[#allocation5 + $0x8] sm:$0xff] %v228_v28  ;;  %v223_v30 = vadd.f32 %v254_v26, %v222_v29 }
 0x19e   :  { %231 = vst [vmem:[#allocation5] sm:$0xff] %v223_v30 }
 0x19f   :  { %351 = shalt.err (!%p348_p9)
}
 0x1a0   :  { %244 = dma.vmem_to_hbm [thread:$0]  %s239_s8, 256, %s430_s5, [#allocation4], %s365_s21, %s365_s21, %s366_s22  }
 0x1a1   :  { %362 = dma.done.wait [#allocation4], 256  }
 0x1a2   :  { %363 = vsyncadd [#allocation4], 4294967040 }
 0x1a3   :  { %248 = vsyncpa [#allocation3], 1 }
 0x1a4   :  { %249 = vsyncpa [#allocation4], 1 }

</bundles_post_ra>
